<compile_context>
chip_gen: v7x
topology: tpu7x:2x2x1
jax: 0.10.0
libtpu: 0.0.40
codegen_flags: <defaults>
</compile_context>

<pallas_src>
import functools
import math

import jax
import jax.numpy as jnp
from jax.experimental import pallas as pl
from jax.experimental.pallas import tpu as pltpu


# ------------------------------------------------------------------------------------------
# Kernel 1: per-batch cumulative-sum embeds (y_embed, x_embed), optionally normalized.
# ------------------------------------------------------------------------------------------
def _embed_kernel(nm_ref, lt_ref, ut_ref, emb_ref, *, normalize, scale):
    # nm_ref : (1, H, W)    f32  not_mask
    # lt_ref : (H, H)       f32  lower-triangular ones  (cumsum over rows)
    # ut_ref : (W, W)       f32  upper-triangular ones  (cumsum over cols)
    # emb_ref: (1, 2, H, W) f32  [0] = y_embed, [1] = x_embed
    nm = nm_ref[0]                                                     # (H, W)
    H, W = nm.shape
    y = jnp.dot(lt_ref[...], nm, preferred_element_type=jnp.float32)  # cumsum over H
    x = jnp.dot(nm, ut_ref[...], preferred_element_type=jnp.float32)  # cumsum over W
    if normalize:
        eps = 1e-6
        # reciprocal-multiply on the tiny (1,W)/(H,1) denominators instead of full divides
        y = y * (scale * pl.reciprocal(y[H - 1:H, :] + eps, approx=False))
        x = x * (scale * pl.reciprocal(x[:, W - 1:W] + eps, approx=False))
    emb_ref[0, 0, :, :] = y
    emb_ref[0, 1, :, :] = x


# ------------------------------------------------------------------------------------------
# Kernel 2: channel-major sinusoidal expansion over a flattened-spatial (lane) tile.
#   out[c, s] = sin(embed[s] * inv_dim_t[c] + phase[c]);  phase = 0 (sin) / pi/2 (cos)
# ------------------------------------------------------------------------------------------
def _expand_kernel(emb_ref, const_ref, out_ref, *, num_pos_feats):
    P = num_pos_feats
    y = emb_ref[0, 0:1, :]            # (1, S_tile)   y_embed (flattened spatial lanes)
    x = emb_ref[0, 1:2, :]            # (1, S_tile)   x_embed
    inv_dim = const_ref[:, 0:1]       # (P, 1)        1 / dim_t
    phase = const_ref[:, 1:2]         # (P, 1)        0 or pi/2
    out_ref[0, :P, :] = jnp.sin(y * inv_dim + phase)   # pos_y -> channels [0, P)
    out_ref[0, P:, :] = jnp.sin(x * inv_dim + phase)   # pos_x -> channels [P, 2P)


def _pick_spatial_tile(S, max_tile=4096):
    # Full extent if small; otherwise a multiple-of-128 tile sized so the (2P, S_tile) output
    # block (double-buffered) + elementwise temporaries fit default scoped VMEM on all gens.
    return S if S <= max_tile else max_tile


def position_embedding_sine(mask, num_pos_feats=64, temperature=10000,
                            normalize=False, scale=None):
    """mask: (B, H, W) bool (True = padding). Returns (B, 2*num_pos_feats, H, W) f32."""
    if scale is not None and normalize is False:
        raise ValueError("normalize should be True if scale is passed")
    if scale is None:
        scale = 2 * math.pi
    if num_pos_feats % 2 != 0:
        raise ValueError("num_pos_feats must be even (sin/cos interleave)")

    B, H, W = mask.shape
    P = num_pos_feats
    S = H * W
    not_mask = (~mask).astype(jnp.float32)

    # Host-built, loop-invariant constants (DMA'd once thanks to constant index_maps).
    lower_tri = jnp.tril(jnp.ones((H, H), jnp.float32))   # y cumsum:  L @ nm
    upper_tri = jnp.triu(jnp.ones((W, W), jnp.float32))   # x cumsum: nm @ U
    idx = jnp.arange(P)
    dim_t = jnp.asarray(temperature, jnp.float32) ** (
        2.0 * (idx // 2).astype(jnp.float32) / P)
    inv_dim_t = 1.0 / dim_t
    phase = jnp.where(idx % 2 == 1, jnp.float32(math.pi / 2.0), jnp.float32(0.0))
    consts = jnp.stack([inv_dim_t, phase], axis=1).astype(jnp.float32)   # (P, 2)

    # ---- Kernel 1: (B, 2, H, W) embeds -----------------------------------------------------
    emb = pl.pallas_call(
        functools.partial(_embed_kernel, normalize=normalize, scale=float(scale)),
        out_shape=jax.ShapeDtypeStruct((B, 2, H, W), jnp.float32),
        grid_spec=pltpu.PrefetchScalarGridSpec(
            num_scalar_prefetch=0,
            grid=(B,),
            in_specs=[
                pl.BlockSpec((1, H, W), lambda b: (b, 0, 0)),
                pl.BlockSpec((H, H), lambda b: (0, 0)),
                pl.BlockSpec((W, W), lambda b: (0, 0)),
            ],
            out_specs=pl.BlockSpec((1, 2, H, W), lambda b: (b, 0, 0, 0)),
        ),
        compiler_params=pltpu.CompilerParams(dimension_semantics=("parallel",)),
    )(not_mask, lower_tri, upper_tri)

    # Free trailing-dim merge: (B, 2, H, W) -> (B, 2, H*W). The flattened spatial axis becomes
    # the lane dimension of kernel 2 (lane-dense loads/stores, no in-kernel relayout).
    emb_flat = emb.reshape(B, 2, S)

    # ---- Kernel 2: (B, 2P, H*W) channel-major expansion ------------------------------------
    s_tile = _pick_spatial_tile(S)
    grid = (B, pl.cdiv(S, s_tile))
    pos_flat = pl.pallas_call(
        functools.partial(_expand_kernel, num_pos_feats=P),
        out_shape=jax.ShapeDtypeStruct((B, 2 * P, S), jnp.float32),
        grid_spec=pltpu.PrefetchScalarGridSpec(
            num_scalar_prefetch=0,
            grid=grid,
            in_specs=[
                pl.BlockSpec((1, 2, s_tile), lambda b, t: (b, 0, t)),
                pl.BlockSpec((P, 2), lambda b, t: (0, 0)),
            ],
            out_specs=pl.BlockSpec((1, 2 * P, s_tile), lambda b, t: (b, 0, t)),
        ),
        compiler_params=pltpu.CompilerParams(
            dimension_semantics=("parallel", "parallel")),
    )(emb_flat, consts)

    # Free trailing-dim split to the PyTorch NCHW output layout: (B, 2P, H, W).
    return pos_flat.reshape(B, 2 * P, H, W)


def _reference(mask, num_pos_feats, temperature, normalize, scale):
    """Pure-JAX mirror of the PyTorch forward for correctness checking."""
    if scale is None:
        scale = 2 * math.pi
    not_mask = (~mask).astype(jnp.float32)
    y_embed = jnp.cumsum(not_mask, axis=1)
    x_embed = jnp.cumsum(not_mask, axis=2)
    if normalize:
        eps = 1e-6
        y_embed = y_embed / (y_embed[:, -1:, :] + eps) * scale
        x_embed = x_embed / (x_embed[:, :, -1:] + eps) * scale
    dim_t = jnp.arange(num_pos_feats, dtype=jnp.float32)
    dim_t = temperature ** (2 * jnp.floor(dim_t / 2) / num_pos_feats)
    pos_x = x_embed[:, :, :, None] / dim_t
    pos_y = y_embed[:, :, :, None] / dim_t
    B, H, W, _ = pos_x.shape
    pos_x = jnp.stack((jnp.sin(pos_x[..., 0::2]), jnp.cos(pos_x[..., 1::2])),
                      axis=4).reshape(B, H, W, -1)
    pos_y = jnp.stack((jnp.sin(pos_y[..., 0::2]), jnp.cos(pos_y[..., 1::2])),
                      axis=4).reshape(B, H, W, -1)
    pos = jnp.concatenate((pos_y, pos_x), axis=3)
    return jnp.transpose(pos, (0, 3, 1, 2))


if __name__ == "__main__":
    key = jax.random.PRNGKey(0)
    B, C, H, W = 2, 4, 16, 16
    num_pos_feats = 32          # -> output channels = 64
    temperature = 10000
    normalize = True            # DETR uses normalize=True; kernel supports both

    kx, kh, kw = jax.random.split(key, 3)
    x = jax.random.normal(kx, (B, C, H, W), dtype=jnp.float32)  # only used for shape parity

    # Padding-style mask: True beyond per-image valid extents (deterministic via PRNGKey(0)).
    valid_h = jax.random.randint(kh, (B,), H // 2, H + 1)
    valid_w = jax.random.randint(kw, (B,), W // 2, W + 1)
    hh = jnp.arange(H)[None, :, None]
    ww = jnp.arange(W)[None, None, :]
    mask = (hh >= valid_h[:, None, None]) | (ww >= valid_w[:, None, None])  # (B, H, W) bool

    pos = position_embedding_sine(mask, num_pos_feats=num_pos_feats,
                                  temperature=temperature, normalize=normalize)
    pos = jax.block_until_ready(pos)

    ref = _reference(mask, num_pos_feats, temperature, normalize, None)
    assert pos.shape == (B, 2 * num_pos_feats, H, W), pos.shape
    assert jnp.max(jnp.abs(pos - ref)) < 1e-3, float(jnp.max(jnp.abs(pos - ref)))

    print("KERNEL_OK")
</pallas_src>

<mosaic_0001>
module attributes {stable_mosaic.version = 11 : i64} {
  func.func @_embed_kernel(%arg0: i32, %arg1: memref<1x16x16xf32, #tpu.memory_space<vmem>>, %arg2: memref<16x16xf32, #tpu.memory_space<vmem>>, %arg3: memref<16x16xf32, #tpu.memory_space<vmem>>, %arg4: memref<1x2x16x16xf32, #tpu.memory_space<vmem>>) attributes {dimension_semantics = [#tpu.dimension_semantics<parallel>], iteration_bounds = array<i64: 2>, scalar_prefetch = 0 : i64, scratch_operands = 0 : i64, tpu.core_type = #tpu.core_type<tc>, window_params = [{transform_indices = @transform_0, window_bounds = array<i64: 1, 16, 16>}, {pipeline_mode = #tpu.pipeline_mode<synchronous>, transform_indices = @transform_1, window_bounds = array<i64: 16, 16>}, {pipeline_mode = #tpu.pipeline_mode<synchronous>, transform_indices = @transform_2, window_bounds = array<i64: 16, 16>}, {transform_indices = @transform_3, window_bounds = array<i64: 1, 2, 16, 16>}]} {
    %c0 = arith.constant 0 : index
    %c0_0 = arith.constant 0 : index
    %c0_1 = arith.constant 0 : index
    %0 = vector.load %arg1[%c0, %c0_0, %c0_1] : memref<1x16x16xf32, #tpu.memory_space<vmem>>, vector<1x16x16xf32>
    %1 = vector.shape_cast %0 : vector<1x16x16xf32> to vector<16x16xf32>
    %c0_2 = arith.constant 0 : index
    %c0_3 = arith.constant 0 : index
    %2 = vector.load %arg2[%c0_2, %c0_3] : memref<16x16xf32, #tpu.memory_space<vmem>>, vector<16x16xf32>
    %cst = arith.constant dense<0.000000e+00> : vector<16x16xf32>
    %3 = tpu.matmul %2, %1, %cst {dimension_numbers = #tpu.dot_dimension_numbers<[1], [0], [0], [1], [0, 0, 1, 1], [], []>} : vector<16x16xf32>, vector<16x16xf32>, vector<16x16xf32> -> vector<16x16xf32>
    %c0_4 = arith.constant 0 : index
    %c0_5 = arith.constant 0 : index
    %4 = vector.load %arg3[%c0_4, %c0_5] : memref<16x16xf32, #tpu.memory_space<vmem>>, vector<16x16xf32>
    %cst_6 = arith.constant dense<0.000000e+00> : vector<16x16xf32>
    %5 = tpu.matmul %1, %4, %cst_6 {dimension_numbers = #tpu.dot_dimension_numbers<[1], [0], [0], [1], [0, 0, 1, 1], [], []>} : vector<16x16xf32>, vector<16x16xf32>, vector<16x16xf32> -> vector<16x16xf32>
    %6 = vector.extract_strided_slice %3 {offsets = [15, 0], sizes = [1, 16], strides = [1, 1]} : vector<16x16xf32> to vector<1x16xf32>
    %cst_7 = arith.constant 9.99999997E-7 : f32
    %7 = vector.broadcast %cst_7 : f32 to vector<1x16xf32>
    %8 = arith.addf %6, %7 : vector<1x16xf32>
    %9 = tpu.reciprocal %8 : vector<1x16xf32> -> vector<1x16xf32>
    %cst_8 = arith.constant 6.28318548 : f32
    %10 = vector.broadcast %cst_8 : f32 to vector<1x16xf32>
    %11 = arith.mulf %10, %9 : vector<1x16xf32>
    %12 = vector.broadcast %11 : vector<1x16xf32> to vector<16x16xf32>
    %13 = arith.mulf %3, %12 : vector<16x16xf32>
    %14 = vector.extract_strided_slice %5 {offsets = [0, 15], sizes = [16, 1], strides = [1, 1]} : vector<16x16xf32> to vector<16x1xf32>
    %cst_9 = arith.constant 9.99999997E-7 : f32
    %15 = vector.broadcast %cst_9 : f32 to vector<16x1xf32>
    %16 = arith.addf %14, %15 : vector<16x1xf32>
    %17 = tpu.reciprocal %16 : vector<16x1xf32> -> vector<16x1xf32>
    %cst_10 = arith.constant 6.28318548 : f32
    %18 = vector.broadcast %cst_10 : f32 to vector<16x1xf32>
    %19 = arith.mulf %18, %17 : vector<16x1xf32>
    %20 = vector.broadcast %19 : vector<16x1xf32> to vector<16x16xf32>
    %21 = arith.mulf %5, %20 : vector<16x16xf32>
    %c0_11 = arith.constant 0 : index
    %c0_12 = arith.constant 0 : index
    %c0_13 = arith.constant 0 : index
    %c0_14 = arith.constant 0 : index
    %22 = vector.load %arg4[%c0_11, %c0_12, %c0_13, %c0_14] : memref<1x2x16x16xf32, #tpu.memory_space<vmem>>, vector<1x1x16x16xf32>
    %23 = vector.shape_cast %22 : vector<1x1x16x16xf32> to vector<16x16xf32>
    %24 = vector.shape_cast %13 : vector<16x16xf32> to vector<1x1x16x16xf32>
    tpu.vector_store %arg4[%c0_11, %c0_12, %c0_13, %c0_14], %24 {strides = array<i32>} : memref<1x2x16x16xf32, #tpu.memory_space<vmem>>, vector<1x1x16x16xf32>,
    %c0_15 = arith.constant 0 : index
    %c1 = arith.constant 1 : index
    %c0_16 = arith.constant 0 : index
    %c0_17 = arith.constant 0 : index
    %25 = vector.load %arg4[%c0_15, %c1, %c0_16, %c0_17] : memref<1x2x16x16xf32, #tpu.memory_space<vmem>>, vector<1x1x16x16xf32>
    %26 = vector.shape_cast %25 : vector<1x1x16x16xf32> to vector<16x16xf32>
    %27 = vector.shape_cast %21 : vector<16x16xf32> to vector<1x1x16x16xf32>
    tpu.vector_store %arg4[%c0_15, %c1, %c0_16, %c0_17], %27 {strides = array<i32>} : memref<1x2x16x16xf32, #tpu.memory_space<vmem>>, vector<1x1x16x16xf32>,
    return
  }
  func.func @transform_0(%arg0: i32) -> (i32, i32, i32) {
    %c0_i32 = arith.constant 0 : i32
    %c0_i32_0 = arith.constant 0 : i32
    %c0_i32_1 = arith.constant 0 : i32
    return %arg0, %c0_i32, %c0_i32_0 : i32, i32, i32
  }
  func.func @transform_1(%arg0: i32) -> (i32, i32) {
    %c0_i32 = arith.constant 0 : i32
    %c0_i32_0 = arith.constant 0 : i32
    %c0_i32_1 = arith.constant 0 : i32
    return %c0_i32, %c0_i32_0 : i32, i32
  }
  func.func @transform_2(%arg0: i32) -> (i32, i32) {
    %c0_i32 = arith.constant 0 : i32
    %c0_i32_0 = arith.constant 0 : i32
    %c0_i32_1 = arith.constant 0 : i32
    return %c0_i32, %c0_i32_0 : i32, i32
  }
  func.func @transform_3(%arg0: i32) -> (i32, i32, i32, i32) {
    %c0_i32 = arith.constant 0 : i32
    %c0_i32_0 = arith.constant 0 : i32
    %c0_i32_1 = arith.constant 0 : i32
    %c0_i32_2 = arith.constant 0 : i32
    return %arg0, %c0_i32, %c0_i32_0, %c0_i32_1 : i32, i32, i32, i32
  }
}

</mosaic_0001>

<bundles_post_ra>
// kernel: tpu_custom_call.1
= control target key start
LH: loop header
LB: loop body
LE: loop exit
PB: predicated region body
PF: predicated region fallthrough
CT: control target
= control target key end

     0   :  { %8 = vsyncpa [#allocation3], 0  ;;  %s1099_s0 = inlined_call_operand.hbm [shape: f32[2,16,16], index: 0, kind: input, shape index: {}]   ;;  %s1100_s1 = inlined_call_operand.hbm [shape: f32[16,16], index: 1, kind: input, shape index: {}]   ;;  %s1101_s2 = inlined_call_operand.hbm [shape: f32[16,16], index: 2, kind: input, shape index: {}]   ;;  %s1102_s3 = inlined_call_operand.hbm [shape: f32[2,2,16,16], index: 3, kind: output, shape index: {}]  }
   0x1   :  { %10 = vsyncpa [#allocation3 + $0x1], 0 }
   0x2   :  { %11 = vsyncpa [#allocation6], 0 }
   0x3   :  { %12 = vsyncpa [#allocation4], 0 }
   0x4   :  { %14 = vsyncpa [#allocation4 + $0x1], 0  ;;  %s847_s12 = smov 0   ;;  %s849_s13 = smov 0  }
   0x5   :  { %s851_s14 = smov 0   ;;  %s853_s15 = smov 0  }
   0x6 LB: > { %s868_s16 = sadd.s32 4294967295, %s816_s15   ;;  %s525_s17 = sadd.s32 4294967294, %s816_s15   ;;  %s816_s15 = sphi %s853_s15, %s1122_s15   ;;  %s812_s14 = sphi %s851_s14, %s1121_s14   ;;  %s808_s13 = sphi %s849_s13, %s1120_s13   ;;  %s804_s12 = sphi %s847_s12, %s1119_s12  }
   0x7   : > { %p40_p0 = scmp.ne.s32.totalorder %s808_s13, %s804_s12  ;;  %p1103_p1 = scmp.eq.s32.totalorder %s868_s16, 0 }
   0x8   : > { %p112_p3 = scmp.eq.s32.totalorder %s525_s17, 1  ;;  %p526_p5 = scmp.ge.s32.totalorder %s816_s15, 1 }
   0x9   : > { %p877_p4 = por %p1103_p1, %p40_p0  ;;  %p119_p7 = scmp.lt.s32.totalorder %s816_s15, 3 }
   0xa   : > { %p882_p6 = por %p112_p3, %p40_p0  ;;  %s818_s21 = smov [#allocation5]  }
   0xb   : > { %s1106_s18 = scalar_select %p877_p4, 1, 0 }
   0xc   : > { %s1107_s19 = scalar_select %p882_p6, 1, 0 }
   0xd   : > { %p887_p8 = pnand %p526_p5, %p119_p7  ;;  %s131_s22 = sshll.u32 %s818_s21, 4  ;;  %s891_s22 = int_to_ptr.vmem [resolvable:$true] %s131_s22 }
   0xe   : > { %s819_s24 = smov [#allocation7]   ;;  %s660_s28 = scalar_lea.hbm %s1100_s1, 256 }
   0xf   : > { %p593_p9 = pneg %p887_p8  ;;  %s144_s25 = sshll.u32 %s819_s24, 4  ;;  %s902_s25 = int_to_ptr.vmem [resolvable:$true] %s144_s25 }
  0x10   : > { %p661_p12 = scmp.ne.s32.totalorder %s1100_s1, %s660_s28  ;;  %p667_p5 = scmp.lt.u32.totalorder %s660_s28, %s1100_s1 }
  0x11   : > { %p898_p11 = pnand %p593_p9, %p1103_p1 }
  0x13   : > { %p662_p13 = pneg %p898_p11 }
  0x15   : > { %p663_p0 = pnand %p662_p13, %p661_p12 }
  0x17   : > { %p664_p3 = pneg %p663_p0 }
  0x19   : > { %p669_p7 = pnand %p667_p5, %p664_p3 }
  0x1b   : > { %672 = shalt.err (!%p669_p7)
}
  0x1c   : > { %s673_s6 = scalar_lea.vmem %s891_s22, 256  ;;  %p681_p2 = scmp.lt.s32.totalorder %s891_s22, %s891_s22 }
  0x1d   : > { %p674_p9 = scmp.ne.s32.totalorder %s891_s22, %s673_s6  ;;  %p682_p12 = scmp.lt.s32.totalorder %s673_s6, %s673_s6 }
  0x1f   : > { %p676_p10 = pnand %p674_p9, %p662_p13  ;;  %p683_p0 = por %p682_p12, %p681_p2 }
  0x21   : > { %p677_p1 = pneg %p676_p10 }
  0x23   : > { %p684_p6 = pnand %p683_p0, %p677_p1 }
  0x25   : > { %687 = shalt.err (!%p684_p6)
}
  0x26   : > { %s820_s7 = smov 128   ;;  %s821_s8 = smov 8  }
  0x27   : > { %596 = dma.hbm_to_vmem [thread:$0]  (!%p898_p11), %s1100_s1, 256, %s891_s22, [#allocation6], %s820_s7, %s820_s7, %s821_s8  }
  0x28   : > { %s688_s21 = scalar_lea.hbm %s1101_s2, 256 }
  0x29   : > { %p689_p1 = scmp.ne.s32.totalorder %s1101_s2, %s688_s21  ;;  %p695_p10 = scmp.lt.u32.totalorder %s688_s21, %s1101_s2 }
  0x2b   : > { %p691_p2 = pnand %p689_p1, %p662_p13 }
  0x2d   : > { %p692_p6 = pneg %p691_p2 }
  0x2f   : > { %p697_p3 = pnand %p695_p10, %p692_p6 }
  0x31   : > { %700 = shalt.err (!%p697_p3)
}
  0x32   : > { %s701_s22 = scalar_lea.vmem %s902_s25, 256  ;;  %p709_p12 = scmp.lt.s32.totalorder %s902_s25, %s902_s25 }
  0x33   : > { %p702_p5 = scmp.ne.s32.totalorder %s902_s25, %s701_s22  ;;  %p710_p0 = scmp.lt.s32.totalorder %s701_s22, %s701_s22 }
  0x35   : > { %p704_p7 = pnand %p702_p5, %p662_p13  ;;  %p711_p1 = por %p710_p0, %p709_p12 }
  0x37   : > { %p705_p9 = pneg %p704_p7 }
  0x39   : > { %p712_p2 = pnand %p711_p1, %p705_p9 }
  0x3b   : > { %715 = shalt.err (!%p712_p2)
}
  0x3c   : > { %599 = dma.hbm_to_vmem [thread:$0]  (!%p898_p11), %s1101_s2, 256, %s902_s25, [#allocation6], %s820_s7, %s820_s7, %s821_s8  }
  0x3d   : > { %s963_s23 = sadd.s32 1, %s816_s15   ;;  %s27_s4 = sadd.s32 1, %s812_s14 }
  0x3e   : > { %s24_s5 = ssub.s32 %s816_s15, %s963_s23  ;;  %p34_p13 = scmp.ne.s32.totalorder %s812_s14, %s808_s13 }
  0x3f   : > { %p25_p6 = scmp.eq.s32.totalorder %s24_s5, 0  ;;  %p35_p10 = scmp.eq.s32.totalorder %s816_s15, 0 }
  0x40   : > { %p1110_p3 = scmp.eq.s32.totalorder %s868_s16, 1  ;;  %p610_p7 = scmp.lt.s32.totalorder %s816_s15, 2 }
  0x41   : > { %s979_s9 = scalar_select %p25_p6, %s812_s14, %s27_s4  }
  0x42   : > { %p973_p5 = por %p1110_p3, %p34_p13  ;;  %p36_p9 = por %p35_p10, %p34_p13 }
  0x43   : > { %s158_s10 = sand.u32 1, %s812_s14   ;;  %s549_s25 = sshll.u32 %s816_s15, 8 }
  0x44   : > { %s1111_s6 = scalar_select %p973_p5, 1, 0 }
  0x45   : > { %s530_s11 = sshll.u32 %s158_s10, 4  ;;  %s986_s24 = scalar_lea.hbm %s1099_s0, %s549_s25 }
  0x46   : > { %s162_s26 = scalar_lea.vmem [#allocation2], %s530_s11  ;;  %p990_p11 = pnand %p610_p7, %p36_p9 }
  0x47   : > { %s169_s27 = sshll.u32 %s162_s26, 4  ;;  %s994_s22 = scalar_lea.sflag [#allocation3], %s158_s10  ;;  %s988_s27 = int_to_ptr.vmem [resolvable:$true] %s169_s27 }
  0x48   : > { %s716_s29 = scalar_lea.hbm %s986_s24, 256  ;;  %p718_p0 = pneg %p990_p11 }
  0x49   : > { %p717_p12 = scmp.ne.s32.totalorder %s986_s24, %s716_s29  ;;  %s721_s5 = scalar_lea.hbm %s1099_s0, 512 }
  0x4a   : > { %p722_p13 = scmp.lt.u32.totalorder %s986_s24, %s1099_s0  ;;  %p723_p6 = scmp.lt.u32.totalorder %s721_s5, %s716_s29 }
  0x4b   : > { %p719_p1 = pnand %p718_p0, %p717_p12  ;;  %p725_p3 = scmp.lt.u32.totalorder %s716_s29, %s986_s24 }
  0x4c   : > { %p724_p10 = por %p723_p6, %p722_p13 }
  0x4d   : > { %p720_p2 = pneg %p719_p1 }
  0x4e   : > { %p726_p7 = por %p725_p3, %p724_p10 }
  0x50   : > { %p727_p9 = pnand %p726_p7, %p720_p2 }
  0x52   : > { %730 = shalt.err (!%p727_p9)
}
  0x53   : > { %s731_s10 = scalar_lea.vmem %s988_s27, 256  ;;  %s822_s17 = smov [#allocation2]  }
  0x54   : > { %p732_p12 = scmp.ne.s32.totalorder %s988_s27, %s731_s10  ;;  %s736_s21 = sshll.u32 %s822_s17, 4  ;;  %s737_s21 = int_to_ptr.vmem [resolvable:$false] %s736_s21 }
  0x55   : > { %s738_s26 = scalar_lea.vmem %s737_s21, 512  ;;  %p739_p4 = scmp.lt.s32.totalorder %s988_s27, %s737_s21 }
  0x56   : > { %p734_p1 = pnand %p732_p12, %p718_p0  ;;  %p740_p13 = scmp.lt.s32.totalorder %s738_s26, %s731_s10 }
  0x58   : > { %p735_p5 = pneg %p734_p1  ;;  %p741_p6 = por %p740_p13, %p739_p4 }
  0x5a   : > { %p742_p10 = pnand %p741_p6, %p735_p5 }
  0x5c   : > { %745 = shalt.err (!%p742_p10)
}
  0x5d   : > { %603 = dma.hbm_to_vmem [thread:$0]  (!%p990_p11), %s986_s24, 256, %s988_s27, %s994_s22, %s820_s7, %s820_s7, %s821_s8  }
  0x5e   : > { %181 = sbr.rel (%p887_p8) target bundleno = 489 (0x1e9), region = 32  ;;  %s1028_s29 = sand.u32 (!%p887_p8), 1, %s808_s13  }
  0x5f   : > { %s534_s30 = sshll.u32 (!%p887_p8), %s1028_s29, 4  ;;  %s184_s4 = scalar_lea.sflag (!%p887_p8), [#allocation3], %s1028_s29 }
  0x60   : > { %s187_s5 = scalar_lea.vmem (!%p887_p8), [#allocation2], %s534_s30  ;;  %p1113_p4 = scmp.ne.s32.totalorder (!%p887_p8), %s1106_s18, 0 }
  0x65   : > { %791 = dma.done.wait (%p1113_p4), %s184_s4, 256  }
  0x66   : > { %793 = vsyncadd (%p1113_p4), %s184_s4, 4294967040  ;;  %p1114_p5 = scmp.eq.s32.totalorder %s868_s16, 0 }
  0x68   : > { %795 = dma.done.wait (%p1114_p5), [#allocation6], 512   ;;  %p1115_p11 = pmov %p1114_p5 }
  0x69   : > { %vm222_vm0 = vcmask 130048   ;;  %v304_v0 = vld [vmem:[#allocation7] sm:$0xff]  ;;  %v305_v1 = vld [vmem:[#allocation7 + $0x8] sm:$0xff]  ;;  %v220_v5 = vld [vmem:[#allocation5] sm:$0xff]  ;;  %v823_v8 = vmov 15   ;;  %v390_v16 = vlaneseq  ;;  %s537_s18 = sshll.u32 %s1028_s29, 5 }
  0x6a   : > { %797 = vsyncadd (%p1115_p11), [#allocation6], 4294966784  ;;  %v218_v2 = vld [vmem:[%s187_s5] sm:$0xff]  ;;  %v577_v3 = vpack.c.bf16 %v305_v1, %v304_v0  ;;  %v219_v4 = vld [vmem:[%s187_s5 + $0x8] sm:$0xff]  ;;  %563 = vmatprep.mubr.msk.f32.mxu0 %vm222_vm0, %v220_v5  ;;  %653 = vset.pattern.permute.xlu0 %v823_v8  ;;  %s217_s20 = scalar_lea.vmem [#allocation8], %s537_s18  ;;  %s550_s8 = sshll.u32 %s868_s16, 9 }
  0x6b   : > { %570 = vmatprep.mubr.msk.f32.mxu1 %vm222_vm0, %v218_v2  ;;  %v573_v6 = vpack.c.bf16 %v219_v4, %v218_v2  ;;  %v221_v7 = vld [vmem:[#allocation5 + $0x8] sm:$0xff]  ;;  %v391_v17 = vshrl.u32 %v390_v16, 7  ;;  %s433_s7 = sshll.u32 %s217_s20, 4  ;;  %s1054_s28 = scalar_lea.hbm %s1102_s3, %s550_s8  ;;  %s1048_s7 = int_to_ptr.vmem [resolvable:$true] %s433_s7 }
  0x6c   : > { %578 = vmatprep.subr.bf16.mxu1 %v577_v3  ;;  %s420_s22 = scalar_lea.sflag [#allocation4], %s1028_s29  ;;  %s746_s11 = scalar_lea.vmem %s1048_s7, 512 }
  0x6d   : > { %580 = vmatpush3.bf16.msra.mxu1 %v577_v3  ;;  %574 = vmatprep.subr.bf16.mxu0 %v573_v6  ;;  %v392_v19 = vsub.s32 7, %v391_v17  ;;  %p747_p8 = scmp.ne.s32.totalorder %s1048_s7, %s746_s11  ;;  %p1116_p0 = scmp.ne.s32.totalorder %s1111_s6, 0 }
  0x6e   : > { %576 = vmatpush3.bf16.msra.mxu0 %v573_v6  ;;  %s824_s16 = smov [#allocation8]  }
  0x6f   : > { %p748_p2 = pnand %p747_p8, %p1116_p0  ;;  %s750_s25 = sshll.u32 %s824_s16, 4  ;;  %s751_s25 = int_to_ptr.vmem [resolvable:$false] %s750_s25 }
  0x70   : > { %571 = vmatmul.mubr.msk.f32.vlgmr.msra.gmra.mrb[0].mxu1 %vm222_vm0, %v219_v4  ;;  %s752_s10 = scalar_lea.vmem %s751_s25, 1024  ;;  %p753_p7 = scmp.lt.s32.totalorder %s1048_s7, %s751_s25 }
  0x71   : > { %564 = vmatmul.mubr.msk.f32.vlgmr.msra.gmra.mrb[0].mxu0 %vm222_vm0, %v221_v7  ;;  %p749_p3 = pneg %p748_p2  ;;  %p754_p9 = scmp.lt.s32.totalorder %s752_s10, %s746_s11 }
  0x73   : > { %p755_p12 = por %p754_p9, %p753_p7 }
  0x75   : > { %p756_p1 = pnand %p755_p12, %p749_p3 }
 0x143   : > { %v572_v9 = vpop.f32.mrb[0].mxu1 }
 0x144   : > { %v397_v10 = vadd.f32 1e-06, %v572_v9  ;;  %v378_v11 = vpop.f32.mrb[1].mxu1  ;;  %v565_v12 = vpop.f32.mrb[0].mxu0 }
 0x145   : > { %v396_v13 = vadd.f32 1e-06, %v378_v11  ;;  %v387_v14 = vadd.f32 1e-06, %v565_v12  ;;  %v295_v15 = vpop.f32.mrb[1].mxu0 }
 0x147   : > { %654 = vrcp.f32 %v396_v13 }
 0x148   : > { %656 = vrcp.f32 %v387_v14 }
 0x149   : > { %658 = vrcp.f32 %v397_v10 }
 0x151   : > { %v655_v18 = vpop.eup %654 }
 0x152   : > { %v657_v20 = vpop.eup %656  ;;  %v400_v21 = vmul.f32 6.2831855, %v655_v18 }
 0x153   : > { %v659_v22 = vpop.eup %658  ;;  %v389_v23 = vmul.f32 6.2831855, %v657_v20 }
 0x154   : > { %404 = vperm.xlu0 %653, %v400_v21   ;;  %v401_v25 = vmul.f32 6.2831855, %v659_v22 }
 0x155   : > { %v393_v24 = vrot.slane %v389_v23, %v392_v19 }
 0x157   : > { %v395_v26 = vmul.f32 %v565_v12, %v393_v24  ;;  %v394_v27 = vmul.f32 %v393_v24, %v295_v15 }
 0x158   : > { %409 = vperm.xlu0 %653, %v401_v25  }
 0x159   : > { %415 = vst.msk [vmem:[%s217_s20 + $0x8] sm:$0xff] %vm222_vm0, %v395_v26  ;;  %414 = vst.msk [vmem:[%s217_s20] sm:$0xff] %vm222_vm0, %v394_v27 }
 0x1d3   : > { %v405_v28 = vpop.permute.xlu0 %404 }
 0x1d4   : > { %v412_v29 = vmul.f32 %v405_v28, %v378_v11 }
 0x1d6   : > { %542 = vst.msk [vmem:[%s217_s20 + $0x10] sm:$0xff] %vm222_vm0, %v412_v29 }
 0x1d7   : > { %v410_v30 = vpop.permute.xlu0 %409 }
 0x1d8   : > { %v413_v31 = vmul.f32 %v572_v9, %v410_v30 }
 0x1da   : > { %543 = vst.msk [vmem:[%s217_s20 + $0x18] sm:$0xff] %vm222_vm0, %v413_v31 }
 0x1db   : > { %759 = shalt.err (!%p756_p1)
}
 0x1dc   : > { %s760_s17 = scalar_lea.hbm %s1054_s28, 512  ;;  %s764_s30 = scalar_lea.hbm %s1102_s3, 1024 }
 0x1dd   : > { %p761_p13 = scmp.ne.s32.totalorder %s1054_s28, %s760_s17  ;;  %p765_p4 = scmp.lt.u32.totalorder %s1054_s28, %s1102_s3 }
 0x1de   : > { %p766_p5 = scmp.lt.u32.totalorder %s764_s30, %s760_s17  ;;  %p768_p8 = scmp.lt.u32.totalorder %s760_s17, %s1054_s28 }
 0x1df   : > { %p762_p6 = pnand %p761_p13, %p1116_p0 }
 0x1e0   : > { %p767_p11 = por %p766_p5, %p765_p4 }
 0x1e1   : > { %p763_p10 = pneg %p762_p6 }
 0x1e2   : > { %p769_p2 = por %p768_p8, %p767_p11 }
 0x1e4   : > { %p770_p3 = pnand %p769_p2, %p763_p10 }
 0x1e6   : > { %773 = shalt.err (!%p770_p3)
}
 0x1e7   : > { %s825_s18 = smov 128   ;;  %s826_s20 = smov 8  }
 0x1e8   : > { %591 = dma.vmem_to_hbm [thread:$0]  (%p1116_p0), %s1048_s7, 512, %s1054_s28, %s420_s22, %s825_s18, %s825_s18, %s826_s20  }
 0x1e9 PF: > { %s448_s8 = sand.u32 1, %s804_s12   ;;  %p1117_p7 = scmp.ne.s32.totalorder %s1107_s19, 0 }
 0x1ea   : > { %p1118_p9 = scmp.ge.s32.totalorder %s816_s15, 2  ;;  %s449_s24 = scalar_lea.sflag [#allocation4], %s448_s8 }
 0x1ec   : > { %p605_p12 = pnand %p1118_p9, %p1117_p7 }
 0x1ee   : > { %799 = dma.done.wait (!%p605_p12), %s449_s24, 512  }
 0x1ef   : > { %801 = vsyncadd (!%p605_p12), %s449_s24, 4294966784  ;;  %p17_p1 = scmp.ge.s32.totalorder %s963_s23, 4   ;;  %s1119_s12 = smov %s808_s13 }
 0x1f0   : > { %s1120_s13 = smov %s812_s14  ;;  %s1121_s14 = smov %s979_s9 }
 0x1f1   : > { %s1122_s15 = smov %s963_s23  ;;  %19 = sbr.rel (!%p17_p1) target bundleno = 6 (0x6), region = 86 }
 0x1f8   :  { %454 = vsyncpa [#allocation3], 1 }
 0x1f9   :  { %456 = vsyncpa [#allocation3 + $0x1], 1 }
 0x1fa   :  { %457 = vsyncpa [#allocation6], 1 }
 0x1fb   :  { %458 = vsyncpa [#allocation4], 1 }
 0x1fc   :  { %460 = vsyncpa [#allocation4 + $0x1], 1 }

</bundles_post_ra>
